<compile_context>
chip_gen: v6e
topology: v6e:2x2x1
jax: 0.10.0
libtpu: 0.0.40
codegen_flags: <defaults>
</compile_context>

<pallas_src>
import functools

import jax
import jax.numpy as jnp
from jax import lax
from jax.experimental import pallas as pl
from jax.experimental.pallas import tpu as pltpu


def mlp_kernel(x_ref, w1_ref, b1_ref, w2_ref, b2_ref, o_ref, *, mxu_dtype):
    # fc1 on the MXU: contract the feature axis of both operands,
    #   (32, 16) . (TILE_N, 16) -> (32, TILE_N), f32 accumulation.
    x_mxu = x_ref[...].astype(mxu_dtype)
    w1_mxu = w1_ref[...].astype(mxu_dtype)
    h = lax.dot_general(
        w1_mxu, x_mxu,
        dimension_numbers=(((1,), (1,)), ((), ())),
        preferred_element_type=jnp.float32)
    # bias (32, 1) broadcast over lanes + ReLU on the VPU, f32.
    h = jnp.maximum(h + b1_ref[...], 0.0)
    # fc2 with out_features = 1: broadcast multiply (VPU) + cross-sublane
    # reduce (XLU) instead of a 1-wide MXU matmul.
    y = jnp.sum(h * w2_ref[...], axis=0, keepdims=True)          # (1, TILE_N)
    o_ref[...] = (y + b2_ref[0]).astype(o_ref.dtype)              # lane-dense store


def net_forward(x, w1, b1, w2, b2, *, tile_n=512, mxu_dtype=jnp.bfloat16):
    """Forward pass of Net.

    x : (N, 16) float32
    w1: (32, 16)  b1: (32,)   -- PyTorch fc1 layout (out_features, in_features)
    w2: (1, 32)   b2: (1,)    -- PyTorch fc2 layout
    returns (N, 1) float32
    """
    n, k_in = x.shape
    hidden = w1.shape[0]

    # Lane tile: multiple of 128, no larger than needed for this batch.
    tile_n = max(128, min(tile_n, pl.cdiv(n, 128) * 128))
    grid = (pl.cdiv(n, tile_n),)

    b1_col = b1.reshape(hidden, 1)     # (32, 1): broadcast over lanes
    w2_col = w2.reshape(hidden, 1)     # (32, 1): broadcast over lanes

    kernel = functools.partial(mlp_kernel, mxu_dtype=mxu_dtype)

    out_row = pl.pallas_call(
        kernel,
        out_shape=jax.ShapeDtypeStruct((1, n), x.dtype),
        grid=grid,
        in_specs=[
            # x: tiled along the batch axis, pipelined across grid steps.
            pl.BlockSpec((tile_n, k_in), lambda i: (i, 0)),
            # Weights / biases: constant index_map -> fetched once, VMEM-resident.
            pl.BlockSpec((hidden, k_in), lambda i: (0, 0)),
            pl.BlockSpec((hidden, 1), lambda i: (0, 0)),
            pl.BlockSpec((hidden, 1), lambda i: (0, 0)),
            # b2 scalar in SMEM.
            pl.BlockSpec(memory_space=pltpu.MemorySpace.SMEM),
        ],
        out_specs=pl.BlockSpec((1, tile_n), lambda i: (0, i)),
        compiler_params=pltpu.CompilerParams(
            dimension_semantics=("parallel",)),   # v7x: shard batch tiles across TCs
    )(x, w1, b1_col, w2_col, b2)

    return out_row.T                   # (N, 1), free reshape, matches PyTorch shape


def init_params(key):
    # Deterministic init mimicking PyTorch nn.Linear default:
    # U(-1/sqrt(fan_in), 1/sqrt(fan_in)) for both weight and bias.
    k1, k2, k3, k4 = jax.random.split(key, 4)
    bound1 = 1.0 / jnp.sqrt(16.0)
    bound2 = 1.0 / jnp.sqrt(32.0)
    w1 = jax.random.uniform(k1, (32, 16), jnp.float32, -bound1, bound1)
    b1 = jax.random.uniform(k2, (32,), jnp.float32, -bound1, bound1)
    w2 = jax.random.uniform(k3, (1, 32), jnp.float32, -bound2, bound2)
    b2 = jax.random.uniform(k4, (1,), jnp.float32, -bound2, bound2)
    return w1, b1, w2, b2


if __name__ == "__main__":
    key = jax.random.PRNGKey(0)
    k_x, k_p = jax.random.split(key)

    # matches `x = torch.randn(10, 16)` in the reference script
    x = jax.random.normal(k_x, (10, 16), jnp.float32)
    w1, b1, w2, b2 = init_params(k_p)

    out = jax.block_until_ready(net_forward(x, w1, b1, w2, b2))
    assert out.shape == (10, 1)

    # Reference 1: exact module math in f32 (loose tol: kernel uses bf16 MXU inputs).
    ref_f32 = jnp.maximum(x @ w1.T + b1, 0.0) @ w2.T + b2
    assert jnp.allclose(out, ref_f32, atol=5e-2, rtol=5e-2), "mismatch vs f32 reference"

    # Reference 2: same bf16 rounding of the matmul inputs, f32 accumulation (tight tol).
    xb = x.astype(jnp.bfloat16).astype(jnp.float32)
    w1b = w1.astype(jnp.bfloat16).astype(jnp.float32)
    ref_bf16 = jnp.maximum(xb @ w1b.T + b1, 0.0) @ w2.T + b2
    assert jnp.allclose(out, ref_bf16, atol=1e-4, rtol=1e-4), "mismatch vs bf16-matched reference"

    print("KERNEL_OK")
</pallas_src>

<mosaic_0001>
module attributes {stable_mosaic.version = 11 : i64} {
  func.func @mlp_kernel(%arg0: i32, %arg1: memref<128x16xf32, #tpu.memory_space<vmem>>, %arg2: memref<32x16xf32, #tpu.memory_space<vmem>>, %arg3: memref<32x1xf32, #tpu.memory_space<vmem>>, %arg4: memref<32x1xf32, #tpu.memory_space<vmem>>, %arg5: memref<1xf32, #tpu.memory_space<smem>>, %arg6: memref<1x128xf32, #tpu.memory_space<vmem>>) attributes {dimension_semantics = [#tpu.dimension_semantics<parallel>], iteration_bounds = array<i64: 1>, scalar_prefetch = 0 : i64, scratch_operands = 0 : i64, tpu.core_type = #tpu.core_type<tc>, window_params = [{transform_indices = @transform_0, window_bounds = array<i64: 128, 16>}, {pipeline_mode = #tpu.pipeline_mode<synchronous>, transform_indices = @transform_1, window_bounds = array<i64: 32, 16>}, {pipeline_mode = #tpu.pipeline_mode<synchronous>, transform_indices = @transform_2, window_bounds = array<i64: 32, 1>}, {pipeline_mode = #tpu.pipeline_mode<synchronous>, transform_indices = @transform_3, window_bounds = array<i64: 32, 1>}, {transform_indices = @transform_4, window_bounds = array<i64: 1>}, {transform_indices = @transform_5, window_bounds = array<i64: 1, 128>}]} {
    %c0 = arith.constant 0 : index
    %c0_0 = arith.constant 0 : index
    %0 = vector.load %arg1[%c0, %c0_0] : memref<128x16xf32, #tpu.memory_space<vmem>>, vector<128x16xf32>
    %1 = arith.truncf %0 : vector<128x16xf32> to vector<128x16xbf16>
    %c0_1 = arith.constant 0 : index
    %c0_2 = arith.constant 0 : index
    %2 = vector.load %arg2[%c0_1, %c0_2] : memref<32x16xf32, #tpu.memory_space<vmem>>, vector<32x16xf32>
    %3 = arith.truncf %2 : vector<32x16xf32> to vector<32x16xbf16>
    %cst = arith.constant dense<0.000000e+00> : vector<32x128xf32>
    %4 = tpu.matmul %3, %1, %cst {dimension_numbers = #tpu.dot_dimension_numbers<[1], [1], [0], [0], [0, 0, 1, 0], [], []>} : vector<32x16xbf16>, vector<128x16xbf16>, vector<32x128xf32> -> vector<32x128xf32>
    %c0_3 = arith.constant 0 : index
    %c0_4 = arith.constant 0 : index
    %5 = vector.load %arg3[%c0_3, %c0_4] : memref<32x1xf32, #tpu.memory_space<vmem>>, vector<32x1xf32>
    %6 = vector.broadcast %5 : vector<32x1xf32> to vector<32x128xf32>
    %7 = arith.addf %4, %6 : vector<32x128xf32>
    %cst_5 = arith.constant 0.000000e+00 : f32
    %8 = vector.broadcast %cst_5 : f32 to vector<32x128xf32>
    %9 = arith.maximumf %7, %8 : vector<32x128xf32>
    %c0_6 = arith.constant 0 : index
    %c0_7 = arith.constant 0 : index
    %10 = vector.load %arg4[%c0_6, %c0_7] : memref<32x1xf32, #tpu.memory_space<vmem>>, vector<32x1xf32>
    %11 = vector.broadcast %10 : vector<32x1xf32> to vector<32x128xf32>
    %12 = arith.mulf %9, %11 : vector<32x128xf32>
    %cst_8 = arith.constant dense<0.000000e+00> : vector<128xf32>
    %13 = vector.multi_reduction <add>, %12, %cst_8 [0] : vector<32x128xf32> to vector<128xf32>
    %14 = vector.shape_cast %13 : vector<128xf32> to vector<1x128xf32>
    %c0_9 = arith.constant 0 : index
    %15 = memref.load %arg5[%c0_9] : memref<1xf32, #tpu.memory_space<smem>>
    %16 = vector.broadcast %15 : f32 to vector<1x128xf32>
    %17 = arith.addf %14, %16 : vector<1x128xf32>
    %c0_10 = arith.constant 0 : index
    %c0_11 = arith.constant 0 : index
    %18 = vector.load %arg6[%c0_10, %c0_11] : memref<1x128xf32, #tpu.memory_space<vmem>>, vector<1x128xf32>
    tpu.vector_store %arg6[%c0_10, %c0_11], %17 {strides = array<i32>} : memref<1x128xf32, #tpu.memory_space<vmem>>, vector<1x128xf32>,
    return
  }
  func.func @transform_0(%arg0: i32) -> (i32, i32) {
    %c0_i32 = arith.constant 0 : i32
    %c0_i32_0 = arith.constant 0 : i32
    return %arg0, %c0_i32 : i32, i32
  }
  func.func @transform_1(%arg0: i32) -> (i32, i32) {
    %c0_i32 = arith.constant 0 : i32
    %c0_i32_0 = arith.constant 0 : i32
    %c0_i32_1 = arith.constant 0 : i32
    return %c0_i32, %c0_i32_0 : i32, i32
  }
  func.func @transform_2(%arg0: i32) -> (i32, i32) {
    %c0_i32 = arith.constant 0 : i32
    %c0_i32_0 = arith.constant 0 : i32
    %c0_i32_1 = arith.constant 0 : i32
    return %c0_i32, %c0_i32_0 : i32, i32
  }
  func.func @transform_3(%arg0: i32) -> (i32, i32) {
    %c0_i32 = arith.constant 0 : i32
    %c0_i32_0 = arith.constant 0 : i32
    %c0_i32_1 = arith.constant 0 : i32
    return %c0_i32, %c0_i32_0 : i32, i32
  }
  func.func @transform_4(%arg0: i32) -> i32 {
    %c0_i32 = arith.constant 0 : i32
    %c0_i32_0 = arith.constant 0 : i32
    return %c0_i32 : i32
  }
  func.func @transform_5(%arg0: i32) -> (i32, i32) {
    %c0_i32 = arith.constant 0 : i32
    %c0_i32_0 = arith.constant 0 : i32
    return %c0_i32, %arg0 : i32, i32
  }
}

</mosaic_0001>

<bundles_post_ra>
// kernel: tpu_custom_call.1
= control target key start
LH: loop header
LB: loop body
LE: loop exit
PB: predicated region body
PF: predicated region fallthrough
CT: control target
= control target key end

     0   :  { %vm77_vm0 = vcmask 130048   ;;  %v282_v5 = vmov 0   ;;  %s422_s0 = inlined_call_operand.vmem [shape: f32[10,16], index: 0, kind: input, shape index: {}]   ;;  %s423_s1 = inlined_call_operand.vmem [shape: f32[32,16], index: 1, kind: input, shape index: {}]   ;;  %s424_s2 = inlined_call_operand.vmem [shape: f32[32,1], index: 2, kind: input, shape index: {}]   ;;  %s425_s3 = inlined_call_operand.vmem [shape: f32[32,1], index: 3, kind: input, shape index: {}]   ;;  %s426_s4 = inlined_call_operand.<no memory space> [shape: f32[1], index: 4, kind: input, shape index: {}]   ;;  %s427_s5 = inlined_call_operand.hbm [shape: f32[1,10], index: 5, kind: output, shape index: {}]  }
   0x1   :  { %v37_v0 = vld [vmem:[%s422_s0 + $0x70] sm:$0xff]  ;;  %v38_v1 = vld [vmem:[%s422_s0 + $0x78] sm:$0xff]  ;;  %v35_v2 = vld [vmem:[%s422_s0 + $0x60] sm:$0xff]  ;;  %258 = vset.pattern.permute.xlu0 %v282_v5  ;;  %259 = vset.pattern.permute.xlu1 %v282_v5 }
   0x2   :  { %v46_v3 = vpack.c.bf16 %v38_v1, %v37_v0  ;;  %v36_v4 = vld [vmem:[%s422_s0 + $0x68] sm:$0xff]  ;;  %v47_v8 = vld [vmem:[%s423_s1] sm:$0xff]  ;;  %v33_v10 = vld [vmem:[%s422_s0 + $0x50] sm:$0xff] }
   0x3   :  { %v45_v6 = vpack.c.bf16 %v36_v4, %v35_v2  ;;  %v48_v9 = vld [vmem:[%s423_s1 + $0x8] sm:$0xff]  ;;  %v34_v11 = vld [vmem:[%s422_s0 + $0x58] sm:$0xff]  ;;  %v53_v13 = vld [vmem:[%s424_s2] sm:$0xff] }
   0x4   :  { %248 = vmatprep.subr.msk.bf16.mxu0 %vm77_vm0, %v46_v3  ;;  %v106_v7 = vsel %vm77_vm0, %v46_v3, 0  ;;  %v51_v12 = vpack.c.bf16 %v48_v9, %v47_v8  ;;  %59 = vperm.xlu0 %258, %v53_v13   ;;  %v55_v14 = vld [vmem:[%s424_s2 + $0x10] sm:$0xff]  ;;  %v54_v15 = vld [vmem:[%s424_s2 + $0x8] sm:$0xff]  ;;  %v44_v17 = vpack.c.bf16 %v34_v11, %v33_v10  ;;  %v56_v18 = vld [vmem:[%s424_s2 + $0x18] sm:$0xff] }
   0x5   :  { %229 = vmatpush3.bf16.xpose.msra.mxu0 %v106_v7  ;;  %69 = vperm.xlu1 %259, %v55_v14   ;;  %v103_v16 = vsel %vm77_vm0, %v45_v6, 0 }
   0x6   :  { %249 = vmatprep.subr.msk.bf16.mxu0 %vm77_vm0, %v45_v6  ;;  %244 = vmatprep.mubr.msk.bf16.mxu0 %vm77_vm0, %v51_v12 }
   0x7   :  { %11 = vsyncpa [#allocation4], 0  ;;  %v161_v19 = vld [vmem:[%s425_s3] sm:$0xff]  ;;  %v162_v20 = vld [vmem:[%s425_s3 + $0x8] sm:$0xff]  ;;  %v100_v24 = vsel %vm77_vm0, %v44_v17, 0  ;;  %s283_s22 = smov [#allocation3]  }
   0x8   :  { %64 = vperm.xlu0 %258, %v54_v15   ;;  %v31_v21 = vld [vmem:[%s422_s0 + $0x40] sm:$0xff]  ;;  %v32_v22 = vld [vmem:[%s422_s0 + $0x48] sm:$0xff]  ;;  %v163_v23 = vld [vmem:[%s425_s3 + $0x10] sm:$0xff]  ;;  %v199_v15 = vstv %s426_s4  ;;  %s208_s23 = sshll.u32 %s283_s22, 4  ;;  %s209_s23 = int_to_ptr.vmem [resolvable:$true] %s208_s23 }
   0x9   :  { %74 = vperm.xlu1 %259, %v56_v18   ;;  %v43_v25 = vpack.c.bf16 %v32_v22, %v31_v21  ;;  %v164_v26 = vld [vmem:[%s425_s3 + $0x18] sm:$0xff]  ;;  %v29_v27 = vld [vmem:[%s422_s0 + $0x30] sm:$0xff]  ;;  %v27_v31 = vld [vmem:[%s422_s0 + $0x20] sm:$0xff]  ;;  %s260_s2 = scalar_lea.vmem %s209_s23, 16  ;;  %s264_s24 = scalar_lea.vmem %s209_s23, 32 }
   0xa   :  { %v30_v28 = vld [vmem:[%s422_s0 + $0x38] sm:$0xff]  ;;  %v28_v32 = vld [vmem:[%s422_s0 + $0x28] sm:$0xff]  ;;  %v25_v35 = vld [vmem:[%s422_s0 + $0x10] sm:$0xff]  ;;  %p261_p0 = scmp.ne.s32.totalorder %s209_s23, %s260_s2  ;;  %p265_p1 = scmp.lt.s32.totalorder %s209_s23, %s209_s23 }
   0xb   :  { %v97_v29 = vsel %vm77_vm0, %v43_v25, 0  ;;  %v42_v30 = vpack.c.bf16 %v30_v28, %v29_v27  ;;  %v41_v34 = vpack.c.bf16 %v28_v32, %v27_v31  ;;  %v26_v36 = vld [vmem:[%s422_s0 + $0x18] sm:$0xff]  ;;  %v23_v39 = vld [vmem:[%s422_s0] sm:$0xff]  ;;  %v24_v40 = vld [vmem:[%s422_s0 + $0x8] sm:$0xff]  ;;  %p266_p2 = scmp.lt.s32.totalorder %s264_s24, %s260_s2 }
   0xc   :  { %167 = vperm.xlu0 %258, %v161_v19   ;;  %v40_v38 = vpack.c.bf16 %v26_v36, %v25_v35  ;;  %v39_v42 = vpack.c.bf16 %v24_v40, %v23_v39  ;;  %v49_v44 = vld [vmem:[%s423_s1 + $0x10] sm:$0xff]  ;;  %v50_v45 = vld [vmem:[%s423_s1 + $0x18] sm:$0xff] }
   0xd   :  { %231 = vmatpush3.bf16.xpose.msra.mxu0 %v103_v16  ;;  %172 = vperm.xlu1 %259, %v162_v20   ;;  %v94_v33 = vsel %vm77_vm0, %v42_v30, 0  ;;  %v91_v37 = vsel %vm77_vm0, %v41_v34, 0  ;;  %v52_v46 = vpack.c.bf16 %v50_v45, %v49_v44  ;;  %p267_p3 = por %p266_p2, %p265_p1 }
   0xe   :  { %250 = vmatprep.subr.msk.bf16.mxu0 %vm77_vm0, %v44_v17  ;;  %v88_v41 = vsel %vm77_vm0, %v40_v38, 0  ;;  %v85_v43 = vsel %vm77_vm0, %v39_v42, 0 }
   0xf   :  { %p268_p4 = pnand %p267_p3, %p261_p0 }
  0x10   :  { %177 = vperm.xlu0 %258, %v163_v23  }
  0x11   :  { %182 = vperm.xlu1 %259, %v164_v26  }
  0x15   :  { %233 = vmatpush3.bf16.xpose.msra.mxu0 %v100_v24 }
  0x16   :  { %251 = vmatprep.subr.msk.bf16.mxu0 %vm77_vm0, %v43_v25 }
  0x1d   :  { %235 = vmatpush3.bf16.xpose.msra.mxu0 %v97_v29 }
  0x1e   :  { %252 = vmatprep.subr.msk.bf16.mxu0 %vm77_vm0, %v42_v30 }
  0x25   :  { %237 = vmatpush3.bf16.xpose.msra.mxu0 %v94_v33 }
  0x26   :  { %253 = vmatprep.subr.msk.bf16.mxu0 %vm77_vm0, %v41_v34 }
  0x2d   :  { %239 = vmatpush3.bf16.xpose.msra.mxu0 %v91_v37 }
  0x2e   :  { %254 = vmatprep.subr.msk.bf16.mxu0 %vm77_vm0, %v40_v38 }
  0x35   :  { %241 = vmatpush3.bf16.xpose.msra.mxu0 %v88_v41 }
  0x36   :  { %255 = vmatprep.subr.msk.bf16.mxu0 %vm77_vm0, %v39_v42 }
  0x3d   :  { %243 = vmatpush3.bf16.xpose.msra.mxu0 %v85_v43 }
  0x44   :  { %245 = vmatmul.mubr.msk.bf16.vlgmr.msra.gmra.mxu0 %vm77_vm0, %v52_v46 }
  0x7f   :  { %v60_v47 = vpop.permute.xlu0 %59 }
  0x80   :  { %v70_v48 = vpop.permute.xlu1 %69 }
  0x83   :  { %v65_v49 = vpop.permute.xlu0 %64 }
  0x84   :  { %v75_v51 = vpop.permute.xlu1 %74 }
  0x87   :  { %v168_v56 = vpop.permute.xlu0 %167 }
  0x88   :  { %v173_v61 = vpop.permute.xlu1 %172 }
  0x8b   :  { %v178_v3 = vpop.permute.xlu0 %177 }
  0x8c   :  { %v183_v6 = vpop.permute.xlu1 %182 }
 0x104   :  { %v246_v50 = vpop.f32.mrf.mxu0 }
 0x105   :  { %v151_v55 = vadd.f32 %v246_v50, %v70_v48 }
 0x106   :  { %v142_v52 = vpop.f32.mrf.mxu0 }
 0x107   :  { %v143_v53 = vadd.f32 %v142_v52, %v60_v47  ;;  %v159_v62 = vmax.f32 %v151_v55, 0.0 }
 0x108   :  { %v247_v54 = vpop.f32.mrf.mxu0 }
 0x109   :  { %v157_v58 = vmax.f32 %v143_v53, 0.0  ;;  %v154_v59 = vadd.f32 %v247_v54, %v75_v51  ;;  %v187_v4 = vmul.f32 %v178_v3, %v159_v62 }
 0x10a   :  { %v145_v57 = vpop.f32.mrf.mxu0 }
 0x10b   :  { %v146_v60 = vadd.f32 %v145_v57, %v65_v49  ;;  %v185_v0 = vmul.f32 %v168_v56, %v157_v58  ;;  %v160_v1 = vmax.f32 %v154_v59, 0.0 }
 0x10d   :  { %v158_v63 = vmax.f32 %v146_v60, 0.0  ;;  %v188_v7 = vmul.f32 %v183_v6, %v160_v1 }
 0x10f   :  { %v186_v2 = vmul.f32 %v173_v61, %v158_v63 }
 0x111   :  { %v189_v5 = vadd.f32 %v186_v2, %v185_v0 }
 0x113   :  { %v190_v8 = vadd.f32 %v189_v5, %v187_v4 }
 0x115   :  { %v191_v9 = vadd.f32 %v190_v8, %v188_v7 }
 0x117   :  { %v192_v10 = vrot.slane %v191_v9, 4 }
 0x119   :  { %v193_v11 = vadd.f32 %v192_v10, %v191_v9 }
 0x11b   :  { %v194_v12 = vrot.slane %v193_v11, 2 }
 0x11d   :  { %v195_v13 = vadd.f32 %v194_v12, %v193_v11 }
 0x11f   :  { %v196_v14 = vrot.slane %v195_v13, 1 }
 0x121   :  { %v197_v16 = vadd.f32 %v196_v14, %v195_v13 }
 0x123   :  { %v200_v17 = vadd.f32 %v199_v15, %v197_v16 }
 0x125   :  { %201 = vst [vmem:[#allocation3] sm:$0x1] %v200_v17 }
 0x126   :  { %271 = shalt.err (!%p268_p4)
}
 0x127   :  { %211 = dma.vmem_to_hbm [thread:$0]  %s209_s23, 16, %s427_s5, [#allocation4]  }
 0x128   :  { %280 = dma.done.wait [#allocation4], 16  }
 0x129   :  { %281 = vsyncadd [#allocation4], 4294967280 }
 0x12a   :  { %215 = vsyncpa [#allocation4], 1 }

</bundles_post_ra>
